<compile_context>
chip_gen: v5e
topology: v5e:2x2
jax: 0.10.0
libtpu: 0.0.40
codegen_flags: <defaults>
</compile_context>

<pallas_src>
import functools
import math

import jax
import jax.numpy as jnp
from jax.experimental import pallas as pl
from jax.experimental.pallas import tpu as pltpu


def _self_attention_kernel(x_ref, wq_ref, wk_ref, wv_ref,
                           bq_ref, bk_ref, bv_ref, mask_ref, o_ref,
                           *, num_heads, head_dim, scale):
    # x_ref:    [1, S, H]   hidden states for this batch element
    # w*_ref:   [H, H]      PyTorch nn.Linear layout (out, in), bf16
    # b*_ref:   [1, H]      f32 biases
    # mask_ref: [1, 1, S]   additive attention mask (0 / -10000 style)
    # o_ref:    [1, S, H]   context layer output
    x = x_ref[0].astype(jnp.bfloat16)                      # [S, H]  feed MXU in bf16
    dn = (((1,), (1,)), ((), ()))                          # contract on W's "in" dim == x @ W^T

    q = jax.lax.dot_general(x, wq_ref[...], dn,
                            preferred_element_type=jnp.float32) + bq_ref[...]
    k = jax.lax.dot_general(x, wk_ref[...], dn,
                            preferred_element_type=jnp.float32) + bk_ref[...]
    v = jax.lax.dot_general(x, wv_ref[...], dn,
                            preferred_element_type=jnp.float32) + bv_ref[...]

    mask = mask_ref[0]                                     # [1, S], broadcasts over query rows

    # Static (unrolled) head loop: static column slices are free views, no dynamic
    # lane indexing, and each head's context is written straight into the fused
    # [S, H] output layout (replaces the permute+reshape of the PyTorch module).
    for h in range(num_heads):
        sl = slice(h * head_dim, (h + 1) * head_dim)
        qh = q[:, sl]                                      # [S, d]
        kh = k[:, sl]
        vh = v[:, sl]

        scores = jax.lax.dot_general(qh, kh, dn,
                                     preferred_element_type=jnp.float32)  # [S, S]
        scores = scores * scale + mask

        # numerically-stable softmax in f32 (VPU/EUP epilogue)
        m = jnp.max(scores, axis=-1, keepdims=True)
        e = jnp.exp(scores - m)
        probs = e / jnp.sum(e, axis=-1, keepdims=True)

        ctx = jnp.dot(probs, vh, preferred_element_type=jnp.float32)      # [S, d]
        o_ref[0, :, sl] = ctx.astype(o_ref.dtype)


def roberta_self_attention(hidden_states, wq, bq, wk, bk, wv, bv,
                           num_attention_heads, attention_mask=None,
                           param_dtype=jnp.bfloat16):
    """hidden_states: [B, S, H]; w*: [H, H] (PyTorch out x in); b*: [H];
    attention_mask: additive mask broadcastable to [B, 1, 1, S] (or None)."""
    B, S, H = hidden_states.shape
    assert H % num_attention_heads == 0
    head_dim = H // num_attention_heads
    scale = 1.0 / math.sqrt(head_dim)

    if attention_mask is None:
        mask = jnp.zeros((B, 1, S), dtype=jnp.float32)
    else:
        mask = attention_mask.reshape(B, 1, S).astype(jnp.float32)

    # Weights streamed to VMEM in bf16 (halves HBM weight traffic; in a real model
    # the params would simply be stored in bf16). Biases stay f32.
    wq_c = wq.astype(param_dtype)
    wk_c = wk.astype(param_dtype)
    wv_c = wv.astype(param_dtype)
    bq2 = bq.reshape(1, H).astype(jnp.float32)
    bk2 = bk.reshape(1, H).astype(jnp.float32)
    bv2 = bv.reshape(1, H).astype(jnp.float32)

    kernel = functools.partial(_self_attention_kernel,
                               num_heads=num_attention_heads,
                               head_dim=head_dim,
                               scale=scale)

    flops = B * (3 * 2 * S * H * H + num_attention_heads * 2 * 2 * S * S * head_dim)
    bytes_accessed = (3 * H * H * wq_c.dtype.itemsize
                      + 2 * B * S * H * hidden_states.dtype.itemsize
                      + B * S * mask.dtype.itemsize)
    transcendentals = B * num_attention_heads * S * S

    out = pl.pallas_call(
        kernel,
        out_shape=jax.ShapeDtypeStruct((B, S, H), hidden_states.dtype),
        grid_spec=pltpu.PrefetchScalarGridSpec(
            num_scalar_prefetch=0,
            grid=(B,),
            in_specs=[
                pl.BlockSpec((1, S, H), lambda b: (b, 0, 0)),   # hidden_states
                pl.BlockSpec((H, H), lambda b: (0, 0)),         # Wq (resident)
                pl.BlockSpec((H, H), lambda b: (0, 0)),         # Wk (resident)
                pl.BlockSpec((H, H), lambda b: (0, 0)),         # Wv (resident)
                pl.BlockSpec((1, H), lambda b: (0, 0)),         # bq
                pl.BlockSpec((1, H), lambda b: (0, 0)),         # bk
                pl.BlockSpec((1, H), lambda b: (0, 0)),         # bv
                pl.BlockSpec((1, 1, S), lambda b: (b, 0, 0)),   # attention mask
            ],
            out_specs=pl.BlockSpec((1, S, H), lambda b: (b, 0, 0)),
        ),
        compiler_params=pltpu.CompilerParams(
            dimension_semantics=("parallel",)),
        cost_estimate=pl.CostEstimate(flops=flops,
                                      transcendentals=transcendentals,
                                      bytes_accessed=bytes_accessed),
    )(hidden_states, wq_c, wk_c, wv_c, bq2, bk2, bv2, mask)
    return out


def _reference(hidden, wq, bq, wk, bk, wv, bv, num_heads, mask):
    B, S, H = hidden.shape
    d = H // num_heads

    def lin(x, w, b):
        return x @ w.T + b

    def split(x):
        return x.reshape(B, S, num_heads, d).transpose(0, 2, 1, 3)

    q = split(lin(hidden, wq, bq))
    k = split(lin(hidden, wk, bk))
    v = split(lin(hidden, wv, bv))
    scores = jnp.einsum('bhqd,bhkd->bhqk', q, k) / math.sqrt(d)
    scores = scores + mask.reshape(B, 1, 1, S)
    probs = jax.nn.softmax(scores, axis=-1)
    ctx = jnp.einsum('bhqk,bhkd->bhqd', probs, v)
    return ctx.transpose(0, 2, 1, 3).reshape(B, S, H)


if __name__ == "__main__":
    B, S, H = 2, 8, 32
    num_heads = 4

    key = jax.random.PRNGKey(0)
    k1, k2, k3, k4, k5, k6, k7 = jax.random.split(key, 7)

    hidden_states = jax.random.normal(k1, (B, S, H), dtype=jnp.float32)
    wq = jax.random.normal(k2, (H, H), dtype=jnp.float32) * 0.02
    wk = jax.random.normal(k3, (H, H), dtype=jnp.float32) * 0.02
    wv = jax.random.normal(k4, (H, H), dtype=jnp.float32) * 0.02
    bq = jax.random.normal(k5, (H,), dtype=jnp.float32) * 0.02
    bk = jax.random.normal(k6, (H,), dtype=jnp.float32) * 0.02
    bv = jax.random.normal(k7, (H,), dtype=jnp.float32) * 0.02

    # HF-style extended additive mask: batch 0 attends to all tokens,
    # batch 1 attends to the first 5 tokens only.
    valid = jnp.array([[1] * S, [1] * 5 + [0] * (S - 5)], dtype=jnp.float32)
    attention_mask = ((1.0 - valid) * -10000.0).reshape(B, 1, 1, S)

    out = roberta_self_attention(hidden_states, wq, bq, wk, bk, wv, bv,
                                 num_attention_heads=num_heads,
                                 attention_mask=attention_mask)
    out = jax.block_until_ready(out)

    ref = _reference(hidden_states, wq, bq, wk, bk, wv, bv, num_heads,
                     attention_mask)

    assert out.shape == (B, S, H)
    # bf16 operand streaming in the kernel vs f32 reference -> loose tolerance.
    assert jnp.allclose(out, ref, atol=2e-2, rtol=2e-2), "mismatch vs reference"
    print("KERNEL_OK")
</pallas_src>

<mosaic_0001>
module attributes {stable_mosaic.version = 11 : i64} {
  func.func @_self_attention_kernel(%arg0: i32, %arg1: memref<1x8x32xf32, #tpu.memory_space<vmem>>, %arg2: memref<32x32xbf16, #tpu.memory_space<vmem>>, %arg3: memref<32x32xbf16, #tpu.memory_space<vmem>>, %arg4: memref<32x32xbf16, #tpu.memory_space<vmem>>, %arg5: memref<1x32xf32, #tpu.memory_space<vmem>>, %arg6: memref<1x32xf32, #tpu.memory_space<vmem>>, %arg7: memref<1x32xf32, #tpu.memory_space<vmem>>, %arg8: memref<1x1x8xf32, #tpu.memory_space<vmem>>, %arg9: memref<1x8x32xf32, #tpu.memory_space<vmem>>) attributes {dimension_semantics = [#tpu.dimension_semantics<parallel>], iteration_bounds = array<i64: 2>, scalar_prefetch = 0 : i64, scratch_operands = 0 : i64, tpu.core_type = #tpu.core_type<tc>, window_params = [{transform_indices = @transform_0, window_bounds = array<i64: 1, 8, 32>}, {pipeline_mode = #tpu.pipeline_mode<synchronous>, transform_indices = @transform_1, window_bounds = array<i64: 32, 32>}, {pipeline_mode = #tpu.pipeline_mode<synchronous>, transform_indices = @transform_2, window_bounds = array<i64: 32, 32>}, {pipeline_mode = #tpu.pipeline_mode<synchronous>, transform_indices = @transform_3, window_bounds = array<i64: 32, 32>}, {pipeline_mode = #tpu.pipeline_mode<synchronous>, transform_indices = @transform_4, window_bounds = array<i64: 1, 32>}, {pipeline_mode = #tpu.pipeline_mode<synchronous>, transform_indices = @transform_5, window_bounds = array<i64: 1, 32>}, {pipeline_mode = #tpu.pipeline_mode<synchronous>, transform_indices = @transform_6, window_bounds = array<i64: 1, 32>}, {transform_indices = @transform_7, window_bounds = array<i64: 1, 1, 8>}, {transform_indices = @transform_8, window_bounds = array<i64: 1, 8, 32>}]} {
    %c0 = arith.constant 0 : index
    %c0_0 = arith.constant 0 : index
    %c0_1 = arith.constant 0 : index
    %0 = vector.load %arg1[%c0, %c0_0, %c0_1] : memref<1x8x32xf32, #tpu.memory_space<vmem>>, vector<1x8x32xf32>
    %1 = vector.shape_cast %0 : vector<1x8x32xf32> to vector<8x32xf32>
    %2 = arith.truncf %1 : vector<8x32xf32> to vector<8x32xbf16>
    %c0_2 = arith.constant 0 : index
    %c0_3 = arith.constant 0 : index
    %3 = vector.load %arg2[%c0_2, %c0_3] : memref<32x32xbf16, #tpu.memory_space<vmem>>, vector<32x32xbf16>
    %cst = arith.constant dense<0.000000e+00> : vector<8x32xf32>
    %4 = tpu.matmul %2, %3, %cst {dimension_numbers = #tpu.dot_dimension_numbers<[1], [1], [0], [0], [0, 0, 1, 0], [], []>} : vector<8x32xbf16>, vector<32x32xbf16>, vector<8x32xf32> -> vector<8x32xf32>
    %c0_4 = arith.constant 0 : index
    %c0_5 = arith.constant 0 : index
    %5 = vector.load %arg5[%c0_4, %c0_5] : memref<1x32xf32, #tpu.memory_space<vmem>>, vector<1x32xf32>
    %6 = vector.broadcast %5 : vector<1x32xf32> to vector<8x32xf32>
    %7 = arith.addf %4, %6 : vector<8x32xf32>
    %c0_6 = arith.constant 0 : index
    %c0_7 = arith.constant 0 : index
    %8 = vector.load %arg3[%c0_6, %c0_7] : memref<32x32xbf16, #tpu.memory_space<vmem>>, vector<32x32xbf16>
    %cst_8 = arith.constant dense<0.000000e+00> : vector<8x32xf32>
    %9 = tpu.matmul %2, %8, %cst_8 {dimension_numbers = #tpu.dot_dimension_numbers<[1], [1], [0], [0], [0, 0, 1, 0], [], []>} : vector<8x32xbf16>, vector<32x32xbf16>, vector<8x32xf32> -> vector<8x32xf32>
    %c0_9 = arith.constant 0 : index
    %c0_10 = arith.constant 0 : index
    %10 = vector.load %arg6[%c0_9, %c0_10] : memref<1x32xf32, #tpu.memory_space<vmem>>, vector<1x32xf32>
    %11 = vector.broadcast %10 : vector<1x32xf32> to vector<8x32xf32>
    %12 = arith.addf %9, %11 : vector<8x32xf32>
    %c0_11 = arith.constant 0 : index
    %c0_12 = arith.constant 0 : index
    %13 = vector.load %arg4[%c0_11, %c0_12] : memref<32x32xbf16, #tpu.memory_space<vmem>>, vector<32x32xbf16>
    %cst_13 = arith.constant dense<0.000000e+00> : vector<8x32xf32>
    %14 = tpu.matmul %2, %13, %cst_13 {dimension_numbers = #tpu.dot_dimension_numbers<[1], [1], [0], [0], [0, 0, 1, 0], [], []>} : vector<8x32xbf16>, vector<32x32xbf16>, vector<8x32xf32> -> vector<8x32xf32>
    %c0_14 = arith.constant 0 : index
    %c0_15 = arith.constant 0 : index
    %15 = vector.load %arg7[%c0_14, %c0_15] : memref<1x32xf32, #tpu.memory_space<vmem>>, vector<1x32xf32>
    %16 = vector.broadcast %15 : vector<1x32xf32> to vector<8x32xf32>
    %17 = arith.addf %14, %16 : vector<8x32xf32>
    %c0_16 = arith.constant 0 : index
    %c0_17 = arith.constant 0 : index
    %c0_18 = arith.constant 0 : index
    %18 = vector.load %arg8[%c0_16, %c0_17, %c0_18] : memref<1x1x8xf32, #tpu.memory_space<vmem>>, vector<1x1x8xf32>
    %19 = vector.shape_cast %18 : vector<1x1x8xf32> to vector<1x8xf32>
    %20 = vector.extract_strided_slice %7 {offsets = [0, 0], sizes = [8, 8], strides = [1, 1]} : vector<8x32xf32> to vector<8x8xf32>
    %21 = vector.extract_strided_slice %12 {offsets = [0, 0], sizes = [8, 8], strides = [1, 1]} : vector<8x32xf32> to vector<8x8xf32>
    %22 = vector.extract_strided_slice %17 {offsets = [0, 0], sizes = [8, 8], strides = [1, 1]} : vector<8x32xf32> to vector<8x8xf32>
    %cst_19 = arith.constant dense<0.000000e+00> : vector<8x8xf32>
    %23 = tpu.matmul %20, %21, %cst_19 {dimension_numbers = #tpu.dot_dimension_numbers<[1], [1], [0], [0], [0, 0, 1, 0], [], []>} : vector<8x8xf32>, vector<8x8xf32>, vector<8x8xf32> -> vector<8x8xf32>
    %cst_20 = arith.constant 0.353553385 : f32
    %24 = vector.broadcast %cst_20 : f32 to vector<8x8xf32>
    %25 = arith.mulf %23, %24 : vector<8x8xf32>
    %26 = vector.broadcast %19 : vector<1x8xf32> to vector<8x8xf32>
    %27 = arith.addf %25, %26 : vector<8x8xf32>
    %cst_21 = arith.constant dense<0xFF800000> : vector<8xf32>
    %28 = vector.multi_reduction <maximumf>, %27, %cst_21 [1] : vector<8x8xf32> to vector<8xf32>
    %29 = vector.shape_cast %28 : vector<8xf32> to vector<8x1xf32>
    %30 = vector.broadcast %29 : vector<8x1xf32> to vector<8x8xf32>
    %31 = arith.subf %27, %30 : vector<8x8xf32>
    %32 = math.exp %31 : vector<8x8xf32>
    %cst_22 = arith.constant dense<0.000000e+00> : vector<8xf32>
    %33 = vector.multi_reduction <add>, %32, %cst_22 [1] : vector<8x8xf32> to vector<8xf32>
    %34 = vector.shape_cast %33 : vector<8xf32> to vector<8x1xf32>
    %35 = vector.broadcast %34 : vector<8x1xf32> to vector<8x8xf32>
    %36 = arith.divf %32, %35 : vector<8x8xf32>
    %cst_23 = arith.constant dense<0.000000e+00> : vector<8x8xf32>
    %37 = tpu.matmul %36, %22, %cst_23 {dimension_numbers = #tpu.dot_dimension_numbers<[1], [0], [0], [1], [0, 0, 1, 1], [], []>} : vector<8x8xf32>, vector<8x8xf32>, vector<8x8xf32> -> vector<8x8xf32>
    %c0_24 = arith.constant 0 : index
    %c0_25 = arith.constant 0 : index
    %c0_26 = arith.constant 0 : index
    %38 = vector.load %arg9[%c0_24, %c0_25, %c0_26] : memref<1x8x32xf32, #tpu.memory_space<vmem>>, vector<1x8x8xf32>
    %39 = vector.shape_cast %38 : vector<1x8x8xf32> to vector<8x8xf32>
    %40 = vector.shape_cast %37 : vector<8x8xf32> to vector<1x8x8xf32>
    tpu.vector_store %arg9[%c0_24, %c0_25, %c0_26], %40 {strides = array<i32>} : memref<1x8x32xf32, #tpu.memory_space<vmem>>, vector<1x8x8xf32>,
    %41 = vector.extract_strided_slice %7 {offsets = [0, 8], sizes = [8, 8], strides = [1, 1]} : vector<8x32xf32> to vector<8x8xf32>
    %42 = vector.extract_strided_slice %12 {offsets = [0, 8], sizes = [8, 8], strides = [1, 1]} : vector<8x32xf32> to vector<8x8xf32>
    %43 = vector.extract_strided_slice %17 {offsets = [0, 8], sizes = [8, 8], strides = [1, 1]} : vector<8x32xf32> to vector<8x8xf32>
    %cst_27 = arith.constant dense<0.000000e+00> : vector<8x8xf32>
    %44 = tpu.matmul %41, %42, %cst_27 {dimension_numbers = #tpu.dot_dimension_numbers<[1], [1], [0], [0], [0, 0, 1, 0], [], []>} : vector<8x8xf32>, vector<8x8xf32>, vector<8x8xf32> -> vector<8x8xf32>
    %cst_28 = arith.constant 0.353553385 : f32
    %45 = vector.broadcast %cst_28 : f32 to vector<8x8xf32>
    %46 = arith.mulf %44, %45 : vector<8x8xf32>
    %47 = vector.broadcast %19 : vector<1x8xf32> to vector<8x8xf32>
    %48 = arith.addf %46, %47 : vector<8x8xf32>
    %cst_29 = arith.constant dense<0xFF800000> : vector<8xf32>
    %49 = vector.multi_reduction <maximumf>, %48, %cst_29 [1] : vector<8x8xf32> to vector<8xf32>
    %50 = vector.shape_cast %49 : vector<8xf32> to vector<8x1xf32>
    %51 = vector.broadcast %50 : vector<8x1xf32> to vector<8x8xf32>
    %52 = arith.subf %48, %51 : vector<8x8xf32>
    %53 = math.exp %52 : vector<8x8xf32>
    %cst_30 = arith.constant dense<0.000000e+00> : vector<8xf32>
    %54 = vector.multi_reduction <add>, %53, %cst_30 [1] : vector<8x8xf32> to vector<8xf32>
    %55 = vector.shape_cast %54 : vector<8xf32> to vector<8x1xf32>
    %56 = vector.broadcast %55 : vector<8x1xf32> to vector<8x8xf32>
    %57 = arith.divf %53, %56 : vector<8x8xf32>
    %cst_31 = arith.constant dense<0.000000e+00> : vector<8x8xf32>
    %58 = tpu.matmul %57, %43, %cst_31 {dimension_numbers = #tpu.dot_dimension_numbers<[1], [0], [0], [1], [0, 0, 1, 1], [], []>} : vector<8x8xf32>, vector<8x8xf32>, vector<8x8xf32> -> vector<8x8xf32>
    %c0_32 = arith.constant 0 : index
    %c0_33 = arith.constant 0 : index
    %c8 = arith.constant 8 : index
    %59 = vector.load %arg9[%c0_32, %c0_33, %c8] : memref<1x8x32xf32, #tpu.memory_space<vmem>>, vector<1x8x8xf32>
    %60 = vector.shape_cast %59 : vector<1x8x8xf32> to vector<8x8xf32>
    %61 = vector.shape_cast %58 : vector<8x8xf32> to vector<1x8x8xf32>
    tpu.vector_store %arg9[%c0_32, %c0_33, %c8], %61 {strides = array<i32>} : memref<1x8x32xf32, #tpu.memory_space<vmem>>, vector<1x8x8xf32>,
    %62 = vector.extract_strided_slice %7 {offsets = [0, 16], sizes = [8, 8], strides = [1, 1]} : vector<8x32xf32> to vector<8x8xf32>
    %63 = vector.extract_strided_slice %12 {offsets = [0, 16], sizes = [8, 8], strides = [1, 1]} : vector<8x32xf32> to vector<8x8xf32>
    %64 = vector.extract_strided_slice %17 {offsets = [0, 16], sizes = [8, 8], strides = [1, 1]} : vector<8x32xf32> to vector<8x8xf32>
    %cst_34 = arith.constant dense<0.000000e+00> : vector<8x8xf32>
    %65 = tpu.matmul %62, %63, %cst_34 {dimension_numbers = #tpu.dot_dimension_numbers<[1], [1], [0], [0], [0, 0, 1, 0], [], []>} : vector<8x8xf32>, vector<8x8xf32>, vector<8x8xf32> -> vector<8x8xf32>
    %cst_35 = arith.constant 0.353553385 : f32
    %66 = vector.broadcast %cst_35 : f32 to vector<8x8xf32>
    %67 = arith.mulf %65, %66 : vector<8x8xf32>
    %68 = vector.broadcast %19 : vector<1x8xf32> to vector<8x8xf32>
    %69 = arith.addf %67, %68 : vector<8x8xf32>
    %cst_36 = arith.constant dense<0xFF800000> : vector<8xf32>
    %70 = vector.multi_reduction <maximumf>, %69, %cst_36 [1] : vector<8x8xf32> to vector<8xf32>
    %71 = vector.shape_cast %70 : vector<8xf32> to vector<8x1xf32>
    %72 = vector.broadcast %71 : vector<8x1xf32> to vector<8x8xf32>
    %73 = arith.subf %69, %72 : vector<8x8xf32>
    %74 = math.exp %73 : vector<8x8xf32>
    %cst_37 = arith.constant dense<0.000000e+00> : vector<8xf32>
    %75 = vector.multi_reduction <add>, %74, %cst_37 [1] : vector<8x8xf32> to vector<8xf32>
    %76 = vector.shape_cast %75 : vector<8xf32> to vector<8x1xf32>
    %77 = vector.broadcast %76 : vector<8x1xf32> to vector<8x8xf32>
    %78 = arith.divf %74, %77 : vector<8x8xf32>
    %cst_38 = arith.constant dense<0.000000e+00> : vector<8x8xf32>
    %79 = tpu.matmul %78, %64, %cst_38 {dimension_numbers = #tpu.dot_dimension_numbers<[1], [0], [0], [1], [0, 0, 1, 1], [], []>} : vector<8x8xf32>, vector<8x8xf32>, vector<8x8xf32> -> vector<8x8xf32>
    %c0_39 = arith.constant 0 : index
    %c0_40 = arith.constant 0 : index
    %c16 = arith.constant 16 : index
    %80 = vector.load %arg9[%c0_39, %c0_40, %c16] : memref<1x8x32xf32, #tpu.memory_space<vmem>>, vector<1x8x8xf32>
    %81 = vector.shape_cast %80 : vector<1x8x8xf32> to vector<8x8xf32>
    %82 = vector.shape_cast %79 : vector<8x8xf32> to vector<1x8x8xf32>
    tpu.vector_store %arg9[%c0_39, %c0_40, %c16], %82 {strides = array<i32>} : memref<1x8x32xf32, #tpu.memory_space<vmem>>, vector<1x8x8xf32>,
    %83 = vector.extract_strided_slice %7 {offsets = [0, 24], sizes = [8, 8], strides = [1, 1]} : vector<8x32xf32> to vector<8x8xf32>
    %84 = vector.extract_strided_slice %12 {offsets = [0, 24], sizes = [8, 8], strides = [1, 1]} : vector<8x32xf32> to vector<8x8xf32>
    %85 = vector.extract_strided_slice %17 {offsets = [0, 24], sizes = [8, 8], strides = [1, 1]} : vector<8x32xf32> to vector<8x8xf32>
    %cst_41 = arith.constant dense<0.000000e+00> : vector<8x8xf32>
    %86 = tpu.matmul %83, %84, %cst_41 {dimension_numbers = #tpu.dot_dimension_numbers<[1], [1], [0], [0], [0, 0, 1, 0], [], []>} : vector<8x8xf32>, vector<8x8xf32>, vector<8x8xf32> -> vector<8x8xf32>
    %cst_42 = arith.constant 0.353553385 : f32
    %87 = vector.broadcast %cst_42 : f32 to vector<8x8xf32>
    %88 = arith.mulf %86, %87 : vector<8x8xf32>
    %89 = vector.broadcast %19 : vector<1x8xf32> to vector<8x8xf32>
    %90 = arith.addf %88, %89 : vector<8x8xf32>
    %cst_43 = arith.constant dense<0xFF800000> : vector<8xf32>
    %91 = vector.multi_reduction <maximumf>, %90, %cst_43 [1] : vector<8x8xf32> to vector<8xf32>
    %92 = vector.shape_cast %91 : vector<8xf32> to vector<8x1xf32>
    %93 = vector.broadcast %92 : vector<8x1xf32> to vector<8x8xf32>
    %94 = arith.subf %90, %93 : vector<8x8xf32>
    %95 = math.exp %94 : vector<8x8xf32>
    %cst_44 = arith.constant dense<0.000000e+00> : vector<8xf32>
    %96 = vector.multi_reduction <add>, %95, %cst_44 [1] : vector<8x8xf32> to vector<8xf32>
    %97 = vector.shape_cast %96 : vector<8xf32> to vector<8x1xf32>
    %98 = vector.broadcast %97 : vector<8x1xf32> to vector<8x8xf32>
    %99 = arith.divf %95, %98 : vector<8x8xf32>
    %cst_45 = arith.constant dense<0.000000e+00> : vector<8x8xf32>
    %100 = tpu.matmul %99, %85, %cst_45 {dimension_numbers = #tpu.dot_dimension_numbers<[1], [0], [0], [1], [0, 0, 1, 1], [], []>} : vector<8x8xf32>, vector<8x8xf32>, vector<8x8xf32> -> vector<8x8xf32>
    %c0_46 = arith.constant 0 : index
    %c0_47 = arith.constant 0 : index
    %c24 = arith.constant 24 : index
    %101 = vector.load %arg9[%c0_46, %c0_47, %c24] : memref<1x8x32xf32, #tpu.memory_space<vmem>>, vector<1x8x8xf32>
    %102 = vector.shape_cast %101 : vector<1x8x8xf32> to vector<8x8xf32>
    %103 = vector.shape_cast %100 : vector<8x8xf32> to vector<1x8x8xf32>
    tpu.vector_store %arg9[%c0_46, %c0_47, %c24], %103 {strides = array<i32>} : memref<1x8x32xf32, #tpu.memory_space<vmem>>, vector<1x8x8xf32>,
    return
  }
  func.func @transform_0(%arg0: i32) -> (i32, i32, i32) {
    %c0_i32 = arith.constant 0 : i32
    %c0_i32_0 = arith.constant 0 : i32
    %c0_i32_1 = arith.constant 0 : i32
    return %arg0, %c0_i32, %c0_i32_0 : i32, i32, i32
  }
  func.func @transform_1(%arg0: i32) -> (i32, i32) {
    %c0_i32 = arith.constant 0 : i32
    %c0_i32_0 = arith.constant 0 : i32
    %c0_i32_1 = arith.constant 0 : i32
    return %c0_i32, %c0_i32_0 : i32, i32
  }
  func.func @transform_2(%arg0: i32) -> (i32, i32) {
    %c0_i32 = arith.constant 0 : i32
    %c0_i32_0 = arith.constant 0 : i32
    %c0_i32_1 = arith.constant 0 : i32
    return %c0_i32, %c0_i32_0 : i32, i32
  }
  func.func @transform_3(%arg0: i32) -> (i32, i32) {
    %c0_i32 = arith.constant 0 : i32
    %c0_i32_0 = arith.constant 0 : i32
    %c0_i32_1 = arith.constant 0 : i32
    return %c0_i32, %c0_i32_0 : i32, i32
  }
  func.func @transform_4(%arg0: i32) -> (i32, i32) {
    %c0_i32 = arith.constant 0 : i32
    %c0_i32_0 = arith.constant 0 : i32
    %c0_i32_1 = arith.constant 0 : i32
    return %c0_i32, %c0_i32_0 : i32, i32
  }
  func.func @transform_5(%arg0: i32) -> (i32, i32) {
    %c0_i32 = arith.constant 0 : i32
    %c0_i32_0 = arith.constant 0 : i32
    %c0_i32_1 = arith.constant 0 : i32
    return %c0_i32, %c0_i32_0 : i32, i32
  }
  func.func @transform_6(%arg0: i32) -> (i32, i32) {
    %c0_i32 = arith.constant 0 : i32
    %c0_i32_0 = arith.constant 0 : i32
    %c0_i32_1 = arith.constant 0 : i32
    return %c0_i32, %c0_i32_0 : i32, i32
  }
  func.func @transform_7(%arg0: i32) -> (i32, i32, i32) {
    %c0_i32 = arith.constant 0 : i32
    %c0_i32_0 = arith.constant 0 : i32
    %c0_i32_1 = arith.constant 0 : i32
    return %arg0, %c0_i32, %c0_i32_0 : i32, i32, i32
  }
  func.func @transform_8(%arg0: i32) -> (i32, i32, i32) {
    %c0_i32 = arith.constant 0 : i32
    %c0_i32_0 = arith.constant 0 : i32
    %c0_i32_1 = arith.constant 0 : i32
    return %arg0, %c0_i32, %c0_i32_0 : i32, i32, i32
  }
}

</mosaic_0001>

<bundles_post_ra>
// kernel: tpu_custom_call.1
= control target key start
LH: loop header
LB: loop body
LE: loop exit
PB: predicated region body
PF: predicated region fallthrough
CT: control target
= control target key end

     0   :  { %s1619_s0 = inlined_call_operand.hbm [shape: f32[2,8,32], index: 0, kind: input, shape index: {}]   ;;  %s1620_s1 = inlined_call_operand.hbm [shape: bf16[32,32], index: 1, kind: input, shape index: {}]   ;;  %s1621_s2 = inlined_call_operand.hbm [shape: bf16[32,32], index: 2, kind: input, shape index: {}]   ;;  %s1622_s3 = inlined_call_operand.hbm [shape: bf16[32,32], index: 3, kind: input, shape index: {}]   ;;  %s1623_s4 = inlined_call_operand.vmem [shape: f32[1,32], index: 4, kind: input, shape index: {}]   ;;  %s1624_s5 = inlined_call_operand.vmem [shape: f32[1,32], index: 5, kind: input, shape index: {}]   ;;  %s1625_s6 = inlined_call_operand.vmem [shape: f32[1,32], index: 6, kind: input, shape index: {}]   ;;  %s1626_s7 = inlined_call_operand.vmem [shape: f32[2,1,8], index: 7, kind: input, shape index: {}]   ;;  %s1627_s8 = inlined_call_operand.hbm [shape: f32[2,8,32], index: 8, kind: output, shape index: {}]  }
   0x1   :  { %1628 = sst [smem:[#allocation15_spill]] %s1620_s1 }
   0x2   :  { %1629 = sst [smem:[#allocation16_spill]] %s1621_s2 }
   0x3   :  { %13 = vsyncpa [#allocation3], 0 }
   0x4   :  { %15 = vsyncpa [#allocation3 + $0x1], 0 }
   0x5   :  { %16 = vsyncpa [#allocation6], 0 }
   0x6   :  { %17 = vsyncpa [#allocation9], 0 }
   0x7   :  { %18 = vsyncpa [#allocation4], 0 }
   0x8   :  { %20 = vsyncpa [#allocation4 + $0x1], 0  ;;  %s1389_s27 = smov 0   ;;  %s1391_s28 = smov 0  }
   0x9   :  { %s1393_s29 = smov 0   ;;  %s1395_s30 = smov 0  }
   0xa LB: > { %s1630_s1 = sld [smem:[#allocation15_spill]]  ;;  %s1413_s12 = sadd.s32 4294967295, %s1331_s30   ;;  %s1331_s30 = sphi %s1395_s30, %s1642_s30   ;;  %s1327_s29 = sphi %s1393_s29, %s1641_s29   ;;  %s1323_s28 = sphi %s1391_s28, %s1640_s28   ;;  %s1319_s27 = sphi %s1389_s27, %s1639_s27  }
   0xb   : > { %p970_p0 = scmp.ge.s32.totalorder %s1331_s30, 1  ;;  %p47_p1 = scmp.eq.s32.totalorder %s1413_s12, 0 }
   0xc   : > { %p235_p2 = scmp.lt.s32.totalorder %s1331_s30, 3  ;;  %s1333_s14 = smov [#allocation5]  }
   0xd   : > { %s248_s15 = sshll.u32 %s1333_s14, 4  ;;  %s1632_s2 = sld [smem:[#allocation16_spill]]  ;;  %s249_s15 = int_to_ptr.vmem [resolvable:$true] %s248_s15 }
   0xe   : > { %p1418_p3 = pnand %p970_p0, %p235_p2  ;;  %s274_s22 = sshll.u32 %s1622_s3, 4  ;;  %s275_s22 = int_to_ptr.hbm [resolvable:$true] %s274_s22 }
   0xf   : > { %s1334_s23 = smov [#allocation7]   ;;  %s1335_s25 = smov 64  }
  0x10   : > { %s246_s11 = sshll.u32 %s1630_s1, 4  ;;  %p1048_p4 = pneg %p1418_p3  ;;  %s247_s11 = int_to_ptr.hbm [resolvable:$true] %s246_s11 }
  0x11   : > { %s262_s24 = sshll.u32 %s1334_s23, 4  ;;  %s1336_s26 = smov 4   ;;  %s263_s24 = int_to_ptr.vmem [resolvable:$true] %s262_s24 }
  0x12   : > { %p1430_p6 = pnand %p1048_p4, %p47_p1  ;;  %s1337_s9 = smov [#allocation8]  }
  0x13   : > { %s260_s18 = sshll.u32 %s1632_s2, 4  ;;  %s276_s10 = sshll.u32 %s1337_s9, 4  ;;  %s261_s18 = int_to_ptr.hbm [resolvable:$true] %s260_s18  ;;  %s277_s10 = int_to_ptr.vmem [resolvable:$true] %s276_s10 }
  0x14   : > { %1051 = dma.hbm_to_vmem [thread:$0]  (!%p1430_p6), %s247_s11, 256, %s249_s15, [#allocation6], %s1335_s25, %s1335_s25, %s1336_s26  }
  0x15   : > { %1054 = dma.hbm_to_vmem [thread:$0]  (!%p1430_p6), %s261_s18, 256, %s263_s24, [#allocation6], %s1335_s25, %s1335_s25, %s1336_s26  }
  0x16   : > { %1057 = dma.hbm_to_vmem [thread:$0]  (!%p1430_p6), %s275_s22, 256, %s277_s10, [#allocation9], %s1335_s25, %s1335_s25, %s1336_s26  }
  0x17   : > { %s969_s14 = sadd.s32 4294967294, %s1331_s30   ;;  %s1445_s16 = sadd.s32 1, %s1331_s30  }
  0x18   : > { %s33_s17 = sadd.s32 1, %s1327_s29  ;;  %s30_s11 = ssub.s32 %s1331_s30, %s1445_s16 }
  0x19   : > { %p40_p7 = scmp.ne.s32.totalorder %s1327_s29, %s1323_s28  ;;  %p31_p8 = scmp.eq.s32.totalorder %s30_s11, 0 }
  0x1a   : > { %p41_p9 = scmp.eq.s32.totalorder %s1331_s30, 0  ;;  %p46_p10 = scmp.ne.s32.totalorder %s1323_s28, %s1319_s27 }
  0x1b   : > { %p222_p11 = scmp.eq.s32.totalorder %s1413_s12, 1  ;;  %p228_p0 = scmp.eq.s32.totalorder %s969_s14, 1 }
  0x1c   : > { %s1457_s15 = scalar_select %p31_p8, %s1327_s29, %s33_s17  }
  0x1d   : > { %p1461_p12 = por %p47_p1, %p46_p10  ;;  %p1465_p13 = por %p222_p11, %p40_p7 }
  0x1e   : > { %p42_p2 = por %p41_p9, %p40_p7  ;;  %s299_s20 = sand.u32 1, %s1327_s29  }
  0x1f   : > { %p1470_p4 = por %p228_p0, %p46_p10  ;;  %p1069_p6 = scmp.lt.s32.totalorder %s1331_s30, 2 }
  0x20   : > { %s975_s22 = sshll.u32 %s299_s20, 3  ;;  %s976_s23 = sshll.u32 %s1331_s30, 3 }
  0x21   : > { %s307_s26 = scalar_lea.hbm %s1619_s0, %s976_s23  ;;  %s303_s10 = scalar_lea.vmem [#allocation2], %s975_s22 }
  0x22   : > { %s309_s9 = sshll.u32 %s307_s26, 4  ;;  %s311_s17 = sshll.u32 %s303_s10, 4  ;;  %s310_s9 = int_to_ptr.hbm [resolvable:$true] %s309_s9  ;;  %s312_s17 = int_to_ptr.vmem [resolvable:$true] %s311_s17 }
  0x23   : > { %p1479_p8 = pnand %p1069_p6, %p42_p2  ;;  %s300_s11 = scalar_lea.sflag [#allocation3], %s299_s20 }
  0x24   : > { %s1227_s1 = sshra.s32 %s310_s9, 4  ;;  %s1234_s22 = scalar_lea.hbm %s1619_s0, 16  ;;  %s1228_s1 = int_to_ptr.hbm [resolvable:$true] %s1227_s1 }
  0x25   : > { %s1229_s2 = scalar_lea.hbm %s1228_s1, 8  ;;  %p1231_p9 = pneg %p1479_p8 }
  0x26   : > { %p1230_p7 = scmp.ne.s32.totalorder %s1228_s1, %s1229_s2  ;;  %p1235_p0 = scmp.lt.s32.totalorder %s1228_s1, %s1619_s0 }
  0x27   : > { %p1236_p2 = scmp.lt.s32.totalorder %s1234_s22, %s1229_s2 }
  0x28   : > { %p1232_p10 = pnand %p1231_p9, %p1230_p7 }
  0x29   : > { %p1237_p6 = por %p1236_p2, %p1235_p0 }
  0x2a   : > { %p1233_p11 = pneg %p1232_p10 }
  0x2c   : > { %p1238_p5 = pnand %p1237_p6, %p1233_p11 }
  0x2e   : > { %1241 = shalt.err (!%p1238_p5)
}
  0x2f   : > { %1061 = dma.hbm_to_vmem [thread:$0]  (!%p1479_p8), %s310_s9, 128, %s312_s17, %s300_s11  }
  0x30   : > { %326 = sbr.rel (%p1418_p3) target bundleno = 1273 (0x4f9), region = 52  ;;  %s1496_s20 = sand.u32 (!%p1418_p3), 1, %s1323_s28  }
  0x31   : > { %s978_s10 = sshll.u32 (!%p1418_p3), %s1496_s20, 3  ;;  %s329_s23 = scalar_lea.sflag (!%p1418_p3), [#allocation3], %s1496_s20 }
  0x32   : > { %s332_s1 = scalar_lea.vmem (!%p1418_p3), [#allocation2], %s978_s10 }
  0x35   : > { %1302 = dma.done.wait (%p1461_p12), %s329_s23, 128  }
  0x36   : > { %1304 = vsyncadd (%p1461_p12), %s329_s23, 4294967168 }
  0x37   : > { %1306 = dma.done.wait (%p47_p1), [#allocation6], 512  }
  0x38   : > { %1308 = vsyncadd (%p47_p1), [#allocation6], 4294966784 }
  0x39   : > { %1310 = dma.done.wait (%p47_p1), [#allocation9], 256  }
  0x3a   : > { %1312 = vsyncadd (%p47_p1), [#allocation9], 4294967040  ;;  %vm408_vm0 = vcmask 261120   ;;  %v1027_v0 = vld [vmem:[#allocation5 + $0x8] sm:$0xff]  ;;  %v1029_v1 = vld [vmem:[#allocation7 + $0x8] sm:$0xff]  ;;  %vm506_vm1 = vcmask 64512  }
  0x3b   : > { %v1031_v2 = vld [vmem:[#allocation8 + $0x8] sm:$0xff]  ;;  %v416_v3 = vsel %vm408_vm0, %v1027_v0, 0  ;;  %v453_v4 = vsel %vm408_vm0, %v1029_v1, 0  ;;  %v1026_v6 = vld [vmem:[#allocation5] sm:$0xff]  ;;  %v1028_v7 = vld [vmem:[#allocation7] sm:$0xff]  ;;  %s1338_s17 = smov 104  }
  0x3c   : > { %424 = vmatpush.bf16.xpose.msra.mxu0 %v416_v3  ;;  %461 = vmatpush.bf16.xpose.msra.mxu1 %v453_v4  ;;  %v490_v5 = vsel %vm408_vm0, %v1031_v2, 0  ;;  %v1030_v8 = vld [vmem:[#allocation8] sm:$0xff]  ;;  %v413_v9 = vsel %vm408_vm0, %v1026_v6, 0  ;;  %v450_v10 = vsel %vm408_vm0, %v1028_v7, 0  ;;  %v388_v12 = vld [vmem:[%s332_s1] sm:$0xff]  ;;  %s1339_s14 = smov 120  }
  0x3d   : > { %498 = vmatpush.bf16.xpose.msra.mxu2 %v490_v5  ;;  %v487_v11 = vsel %vm408_vm0, %v1030_v8, 0  ;;  %v389_v13 = vpack.c.bf16 %v388_v12, %v388_v12  ;;  %v1118_v14 = vld [vmem:[%s1624_s5] ss:$0 sm:$0xff]  ;;  %p384_p1 = scmp.lt.s32.totalorder %s1413_s12, 1  ;;  %s1340_s26 = smov 112  }
  0x3e   : > { %v1117_v15 = vld [vmem:[%s1623_s4] ss:$0 sm:$0xff]  ;;  %s1560_s2 = scalar_lea.vmem [#allocation10], %s978_s10  ;;  %s1341_s10 = smov 16  }
  0x3f   : > { %s385_s11 = scalar_select %p384_p1, %s1413_s12, 1  ;;  %v1119_v22 = vld [vmem:[%s1625_s6] ss:$0 sm:$0xff] }
  0x40   : > { %s1342_s13 = smov 8   ;;  %s1343_s18 = smov 24  }
  0x41   : > { %s386_s25 = scalar_lea.vmem %s1626_s7, %s385_s11  ;;  %s1023_s9 = sshll.u32 %s1413_s12, 3 }
  0x42   : > { %v1120_v29 = vld [vmem:[%s386_s25] ss:$0 sm:$0xff]  ;;  %s856_s11 = scalar_lea.hbm %s1627_s8, %s1023_s9  ;;  %s858_s24 = sshll.u32 %s1560_s2, 4  ;;  %s859_s24 = int_to_ptr.vmem [resolvable:$true] %s858_s24 }
  0x43   : > { %s860_s22 = sshll.u32 %s856_s11, 4  ;;  %s846_s25 = scalar_lea.sflag [#allocation4], %s1496_s20  ;;  %s861_s22 = int_to_ptr.hbm [resolvable:$true] %s860_s22 }
  0x44   : > { %425 = vmatpush.bf16.xpose.msra.mxu0 %v413_v9  ;;  %462 = vmatpush.bf16.xpose.msra.mxu1 %v450_v10 }
  0x45   : > { %499 = vmatpush.bf16.xpose.msra.mxu2 %v487_v11 }
  0x4b   : > { %991 = vmatmul.msk.bf16.vlgmr.msra.gmra.mxu0 %vm408_vm0, %v389_v13  ;;  %1000 = vmatmul.msk.bf16.vlgmr.msra.gmra.mxu1 %vm408_vm0, %v389_v13 }
  0x4c   : > { %1009 = vmatmul.msk.bf16.vlgmr.msra.gmra.mxu2 %vm408_vm0, %v389_v13 }
  0xc8   : > { %v427_v16 = vpop.f32.mrf.mxu0  ;;  %v464_v17 = vpop.f32.mrf.mxu1 }
  0xc9   : > { %v465_v18 = vadd.f32 %v1118_v14, %v464_v17  ;;  %v428_v19 = vadd.f32 %v1117_v15, %v427_v16 }
  0xcb   : > { %761 = vrot.lane.b32.xlu2 %v465_v18, %s1338_s17  ;;  %588 = vrot.lane.b32.xlu1 %v465_v18, %s1339_s14 }
  0xcc   : > { %1010 = vmatpush.xpose.msk.msra.mxu3 %vm506_vm1, %v465_v18 }
  0xcf   : > { %1011 = vmatmul.msk.f32.vlgmr.msra.gmra.mxu3 %vm506_vm1, %v428_v19  ;;  %v501_v23 = vpop.f32.mrf.mxu2 }
  0xd0   : > { %v429_v20 = vpop.f32.mrf.mxu0  ;;  %v466_v21 = vpop.f32.mrf.mxu1  ;;  %v1544_v24 = vadd.f32 %v1119_v22, %v501_v23 }
  0xd2   : > { %580 = vmatpush.msrb.mxu3 %v1544_v24 }
  0xd3   : > { %759 = vrot.lane.b32.xlu2 %v428_v19, %s1338_s17  ;;  %586 = vrot.lane.b32.xlu1 %v428_v19, %s1339_s14 }
  0xd7   : > { %v503_v25 = vpop.f32.mrf.mxu2 }
  0xdb   : > { %673 = vrot.lane.b32.xlu1 %v428_v19, %s1340_s26 }
 0x125   : > { %v762_v26 = vpop.permute.xlu2 %761 }
 0x126   : > { %1019 = vmatpush.xpose.msk.msrb.mxu2 %vm506_vm1, %v762_v26 }
 0x12d   : > { %v760_v27 = vpop.permute.xlu2 %759 }
 0x12e   : > { %1020 = vmatmul.msk.f32.vlgmr.msrb.gmra.mxu2 %vm506_vm1, %v760_v27 }
 0x13d   : > { %v589_v28 = vpop.permute.xlu1 %588 }
 0x13e   : > { %1013 = vmatpush.xpose.msk.msra.mxu3 %vm506_vm1, %v589_v28 }
 0x145   : > { %v587_v48 = vpop.permute.xlu1 %586 }
 0x14d   : > { %v674_v57 = vpop.permute.xlu1 %673 }
 0x152   : > { %v530_v30 = vpop.f32.mrf.mxu3 }
 0x153   : > { %v533_v31 = vmul.f32 0.35355338, %v530_v30 }
 0x155   : > { %v537_v32 = vadd.f32 %v1120_v29, %v533_v31 }
 0x157   : > { %v538_v33 = vsel %vm506_vm1, %v537_v32, -inf }
 0x158   : > { %539 = vmax.xlane.f32.xlu0 %v538_v33 }
 0x1b1   : > { %v784_v34 = vpop.f32.mrf.mxu2 }
 0x1b2   : > { %v787_v35 = vmul.f32 0.35355338, %v784_v34 }
 0x1b4   : > { %v788_v36 = vadd.f32 %v1120_v29, %v787_v35 }
 0x1b6   : > { %v789_v37 = vsel %vm506_vm1, %v788_v36, -inf }
 0x1b7   : > { %790 = vmax.xlane.f32.xlu1 %v789_v37 }
 0x1cb   : > { %v540_v38 = vpop.xlane.xlu0 %539 }
 0x1cc   : > { %v541_v39 = vsub.f32 %v537_v32, %v540_v38 }
 0x1ce   : > { %v542_v40 = vmul.f32 1.442695, %v541_v39 }
 0x1d0   : > { %1121 = vpow2.f32 %v542_v40 }
 0x1d6   : > { %v1122_v41 = vpop.eup %1121 }
 0x1d7   : > { %v544_v42 = vsel %vm506_vm1, %v1122_v41, 0.0 }
 0x1d8   : > { %545 = vadd.xlane.f32.xlu0 %v544_v42 }
 0x1ec   : > { %675 = vrot.lane.b32.xlu0 %v465_v18, %s1340_s26 }
 0x22a   : > { %v791_v62 = vpop.xlane.xlu1 %790 }
 0x22b   : > { %v792_v0 = vsub.f32 %v788_v36, %v791_v62 }
 0x22d   : > { %v793_v1 = vmul.f32 1.442695, %v792_v0 }
 0x24b   : > { %v546_v43 = vpop.xlane.xlu0 %545 }
 0x24c   : > { %1123 = vrcp.f32 %v546_v43  ;;  %v558_v47 = vand.u32 2147483648, %v546_v43  ;;  %v556_v50 = vand.u32 2147483647, %v546_v43  ;;  %vm552_vm3 = vweird.f32 %v546_v43 }
 0x24d   : > { %1125 = vpow2.f32 %v793_v1 }
 0x24e   : > { %v559_v52 = vor.u32 1.1754944e-38, %v558_v47  ;;  %vm557_vm5 = vcmp.eq.f32.partialorder %v556_v50, 8.507059e+37 }
 0x252   : > { %v1124_v44 = vpop.eup %1123 }
 0x253   : > { %v548_v45 = vmul.f32 %v1124_v44, %v546_v43  ;;  %vm553_vm2 = vweird.f32 %v1124_v44  ;;  %v1566_v6 = vpop.eup %1125 }
 0x254   : > { %vm554_vm4 = vmor %vm552_vm3, %vm553_vm2  ;;  %v795_v7 = vsel %vm506_vm1, %v1566_v6, 0.0  ;;  %vm671_vm3 = vcmask 130112  }
 0x255   : > { %v549_v46 = vsub.f32 1.0, %v548_v45 }
 0x257   : > { %v550_v49 = vmul.f32 %v1124_v44, %v549_v46 }
 0x259   : > { %v551_v51 = vadd.f32 %v1124_v44, %v550_v49 }
 0x25b   : > { %v555_v53 = vsel %vm554_vm4, %v1124_v44, %v551_v51  ;;  %vm757_vm4 = vcmask 195712  }
 0x25c   : > { %v560_v54 = vsel %vm557_vm5, %v559_v52, %v555_v53 }
 0x25d   : > { %v561_v55 = vmul.f32 %v1122_v41, %v560_v54 }
 0x25e   : > { %v676_v56 = vpop.permute.xlu0 %675 }
 0x25f   : > { %1012 = vmatmul.msk.f32.vlgmr.msrb.gmra.mxu3 %vm506_vm1, %v561_v55  ;;  %1016 = vmatpush.xpose.msk.msrb.mxu0 %vm506_vm1, %v676_v56 }
 0x262   : > { %1017 = vmatmul.msk.f32.vlgmr.msrb.gmra.mxu0 %vm506_vm1, %v674_v57 }
 0x267   : > { %1014 = vmatmul.msk.f32.vlgmr.msra.gmra.mxu3 %vm506_vm1, %v587_v48 }
 0x2df   : > { %v698_v58 = vpop.f32.mrf.mxu0 }
 0x2e0   : > { %v701_v59 = vmul.f32 0.35355338, %v698_v58 }
 0x2e2   : > { %v702_v60 = vadd.f32 %v1120_v29, %v701_v59  ;;  %v582_v61 = vpop.f32.mrf.mxu3 }
 0x2e3   : > { %585 = vst.msk [vmem:[%s1560_s2] sm:$0xff] %vm506_vm1, %v582_v61 }
 0x2e4   : > { %v703_v63 = vsel %vm506_vm1, %v702_v60, -inf }
 0x2e5   : > { %704 = vmax.xlane.f32.xlu0 %v703_v63 }
 0x2ea   : > { %v611_v2 = vpop.f32.mrf.mxu3 }
 0x2eb   : > { %v614_v3 = vmul.f32 0.35355338, %v611_v2 }
 0x2ed   : > { %v615_v4 = vadd.f32 %v1120_v29, %v614_v3 }
 0x2ef   : > { %v616_v5 = vsel %vm506_vm1, %v615_v4, -inf }
 0x2f0   : > { %617 = vmax.xlane.f32.xlu2 %v616_v5 }
 0x2f8   : > { %796 = vadd.xlane.f32.xlu2 %v795_v7 }
 0x2f9   : > { %727 = vrot.lane.b32.xlu0 %v1544_v24, %s1340_s26  ;;  %s1271_s26 = sshra.s32 %s861_s22, 4  ;;  %s1272_s26 = int_to_ptr.hbm [resolvable:$true] %s1271_s26 }
 0x2fa   : > { %s1273_s23 = scalar_lea.hbm %s1272_s26, 8  ;;  %p1278_p8 = scmp.lt.s32.totalorder %s1272_s26, %s1627_s8 }
 0x2fb   : > { %p1274_p3 = scmp.ne.s32.totalorder %s1272_s26, %s1273_s23 }
 0x2fd   : > { %p1275_p5 = pnand %p1274_p3, %p1465_p13 }
 0x2ff   : > { %p1276_p12 = pneg %p1275_p5 }
 0x358   : > { %v705_v8 = vpop.xlane.xlu0 %704 }
 0x359   : > { %v706_v9 = vsub.f32 %v702_v60, %v705_v8 }
 0x35b   : > { %v707_v10 = vmul.f32 1.442695, %v706_v9 }
 0x35d   : > { %1127 = vpow2.f32 %v707_v10 }
 0x363   : > { %v1128_v11 = vpop.eup %1127  ;;  %v618_v12 = vpop.xlane.xlu2 %617 }
 0x364   : > { %v619_v13 = vsub.f32 %v615_v4, %v618_v12  ;;  %v709_v14 = vsel %vm506_vm1, %v1128_v11, 0.0 }
 0x365   : > { %710 = vadd.xlane.f32.xlu1 %v709_v14 }
 0x366   : > { %v620_v15 = vmul.f32 1.442695, %v619_v13 }
 0x368   : > { %1129 = vpow2.f32 %v620_v15 }
 0x36b   : > { %v728_v16 = vpop.permute.xlu0 %727  ;;  %v797_v20 = vpop.xlane.xlu2 %796 }
 0x36c   : > { %748 = vmatpush.msrb.mxu1 %v728_v16  ;;  %v809_v49 = vand.u32 2147483648, %v797_v20  ;;  %vm803_vm15 = vweird.f32 %v797_v20  ;;  %v807_v51 = vand.u32 2147483647, %v797_v20 }
 0x36e   : > { %v1130_v17 = vpop.eup %1129  ;;  %v810_v54 = vor.u32 1.1754944e-38, %v809_v49  ;;  %vm808_vm2 = vcmp.eq.f32.partialorder %v807_v51, 8.507059e+37 }
 0x36f   : > { %v622_v18 = vsel %vm506_vm1, %v1130_v17, 0.0 }
 0x370   : > { %623 = vadd.xlane.f32.xlu2 %v622_v18 }
 0x37e   : > { %813 = vrot.lane.b32.xlu1 %v1544_v24, %s1338_s17 }
 0x388   : > { %641 = vrot.lane.b32.xlu2 %v1544_v24, %s1339_s14 }
 0x3d8   : > { %v711_v19 = vpop.xlane.xlu1 %710 }
 0x3d9   : > { %1131 = vrcp.f32 %v711_v19  ;;  %v723_v25 = vand.u32 2147483648, %v711_v19  ;;  %v721_v29 = vand.u32 2147483647, %v711_v19  ;;  %vm717_vm7 = vweird.f32 %v711_v19 }
 0x3da   : > { %1133 = vrcp.f32 %v797_v20 }
 0x3db   : > { %v724_v32 = vor.u32 1.1754944e-38, %v723_v25  ;;  %vm722_vm9 = vcmp.eq.f32.partialorder %v721_v29, 8.507059e+37 }
 0x3df   : > { %v1132_v21 = vpop.eup %1131 }
 0x3e0   : > { %v713_v22 = vmul.f32 %v1132_v21, %v711_v19  ;;  %v1134_v27 = vpop.eup %1133  ;;  %vm718_vm6 = vweird.f32 %v1132_v21 }
 0x3e1   : > { %v799_v31 = vmul.f32 %v1134_v27, %v797_v20  ;;  %vm719_vm8 = vmor %vm717_vm7, %vm718_vm6  ;;  %vm804_vm13 = vweird.f32 %v1134_v27 }
 0x3e2   : > { %v714_v23 = vsub.f32 1.0, %v713_v22  ;;  %vm805_vm0 = vmor %vm803_vm15, %vm804_vm13 }
 0x3e3   : > { %v624_v26 = vpop.xlane.xlu2 %623  ;;  %v800_v36 = vsub.f32 1.0, %v799_v31 }
 0x3e4   : > { %v715_v28 = vmul.f32 %v1132_v21, %v714_v23  ;;  %1135 = vrcp.f32 %v624_v26  ;;  %v636_v40 = vand.u32 2147483648, %v624_v26  ;;  %v634_v43 = vand.u32 2147483647, %v624_v26 }
 0x3e5   : > { %v801_v41 = vmul.f32 %v1134_v27, %v800_v36  ;;  %vm630_vm11 = vweird.f32 %v624_v26 }
 0x3e6   : > { %v716_v30 = vadd.f32 %v1132_v21, %v715_v28  ;;  %v637_v46 = vor.u32 1.1754944e-38, %v636_v40  ;;  %vm635_vm14 = vcmp.eq.f32.partialorder %v634_v43, 8.507059e+37 }
 0x3e7   : > { %v802_v47 = vadd.f32 %v1134_v27, %v801_v41 }
 0x3e8   : > { %v720_v24 = vsel %vm719_vm8, %v1132_v21, %v716_v30 }
 0x3e9   : > { %v725_v33 = vsel %vm722_vm9, %v724_v32, %v720_v24  ;;  %v806_v53 = vsel %vm805_vm0, %v1134_v27, %v802_v47 }
 0x3ea   : > { %v1136_v34 = vpop.eup %1135  ;;  %v726_v35 = vmul.f32 %v1128_v11, %v725_v33  ;;  %v811_v55 = vsel %vm808_vm2, %v810_v54, %v806_v53 }
 0x3eb   : > { %v626_v37 = vmul.f32 %v1136_v34, %v624_v26  ;;  %v642_v38 = vpop.permute.xlu2 %641  ;;  %vm631_vm10 = vweird.f32 %v1136_v34  ;;  %v812_v56 = vmul.f32 %v1566_v6, %v811_v55 }
 0x3ec   : > { %662 = vmatpush.msrb.mxu3 %v642_v38  ;;  %1018 = vmatmul.msk.f32.vlgmr.msrb.gmra.mxu1 %vm506_vm1, %v726_v35  ;;  %vm632_vm12 = vmor %vm630_vm11, %vm631_vm10 }
 0x3ed   : > { %v627_v39 = vsub.f32 1.0, %v626_v37 }
 0x3ef   : > { %v628_v42 = vmul.f32 %v1136_v34, %v627_v39 }
 0x3f0   : > { %v814_v44 = vpop.permute.xlu1 %813 }
 0x3f1   : > { %v629_v45 = vadd.f32 %v1136_v34, %v628_v42  ;;  %834 = vmatpush.msra.mxu3 %v814_v44 }
 0x3f3   : > { %v633_v48 = vsel %vm632_vm12, %v1136_v34, %v629_v45 }
 0x3f4   : > { %v638_v50 = vsel %vm635_vm14, %v637_v46, %v633_v48 }
 0x3f5   : > { %v639_v52 = vmul.f32 %v1130_v17, %v638_v50 }
 0x3f7   : > { %1015 = vmatmul.msk.f32.vlgmr.msrb.gmra.mxu3 %vm506_vm1, %v639_v52 }
 0x3ff   : > { %1021 = vmatmul.msk.f32.vlgmr.msra.gmra.mxu3 %vm506_vm1, %v812_v56  ;;  %vm843_vm1 = vcmask 261312  }
 0x469   : > { %v750_v57 = vpop.f32.mrf.mxu1 }
 0x46a   : > { %754 = vrot.lane.b32.xlu0 %v750_v57, %s1341_s10  ;;  %s1277_s10 = scalar_lea.hbm %s1627_s8, 16 }
 0x46b   : > { %p1279_p7 = scmp.lt.s32.totalorder %s1277_s10, %s1273_s23 }
 0x46d   : > { %p1280_p9 = por %p1279_p7, %p1278_p8 }
 0x46f   : > { %p1281_p10 = pnand %p1280_p9, %p1276_p12 }
 0x47a   : > { %v664_v58 = vpop.f32.mrf.mxu3 }
 0x47b   : > { %668 = vrot.lane.b32.xlu2 %v664_v58, %s1342_s13 }
 0x482   : > { %v836_v59 = vpop.f32.mrf.mxu3 }
 0x483   : > { %840 = vrot.lane.b32.xlu1 %v836_v59, %s1343_s18 }
 0x4d5   : > { %v669_v60 = vpop.permute.xlu2 %668 }
 0x4d6   : > { %672 = vst.msk [vmem:[%s1560_s2] sm:$0xff] %vm671_vm3, %v669_v60 }
 0x4dc   : > { %v755_v61 = vpop.permute.xlu0 %754 }
 0x4dd   : > { %758 = vst.msk [vmem:[%s1560_s2] sm:$0xff] %vm757_vm4, %v755_v61 }
 0x4f5   : > { %v841_v62 = vpop.permute.xlu1 %840 }
 0x4f6   : > { %844 = vst.msk [vmem:[%s1560_s2] sm:$0xff] %vm843_vm1, %v841_v62 }
 0x4f7   : > { %1284 = shalt.err (!%p1281_p10)
}
 0x4f8   : > { %1046 = dma.vmem_to_hbm [thread:$0]  (%p1465_p13), %s859_s24, 128, %s861_s22, %s846_s25  }
 0x4f9 PF: > { %s872_s20 = sand.u32 1, %s1319_s27   ;;  %p1638_p11 = scmp.ge.s32.totalorder %s1331_s30, 2 }
 0x4fa   : > { %s873_s2 = scalar_lea.sflag [#allocation4], %s872_s20 }
 0x4fb   : > { %p1063_p0 = pnand %p1638_p11, %p1470_p4 }
 0x4fd   : > { %p1064_p2 = pneg %p1063_p0 }
 0x4ff   : > { %1314 = dma.done.wait (%p1064_p2), %s873_s2, 128  }
 0x500   : > { %1316 = vsyncadd (%p1064_p2), %s873_s2, 4294967168  ;;  %p23_p6 = scmp.ge.s32.totalorder %s1445_s16, 4   ;;  %s1639_s27 = smov %s1323_s28 }
 0x501   : > { %s1640_s28 = smov %s1327_s29  ;;  %s1641_s29 = smov %s1457_s15 }
 0x502   : > { %s1642_s30 = smov %s1445_s16  ;;  %25 = sbr.rel (!%p23_p6) target bundleno = 10 (0xa), region = 112 }
 0x507   :  { %879 = vsyncpa [#allocation3], 1 }
 0x508   :  { %881 = vsyncpa [#allocation3 + $0x1], 1 }
 0x509   :  { %882 = vsyncpa [#allocation6], 1 }
 0x50a   :  { %883 = vsyncpa [#allocation9], 1 }
 0x50b   :  { %884 = vsyncpa [#allocation4], 1 }
 0x50c   :  { %886 = vsyncpa [#allocation4 + $0x1], 1 }

</bundles_post_ra>
